<compile_context>
chip_gen: v6e
topology: v6e:2x2x1
jax: 0.10.0
libtpu: 0.0.40
codegen_flags: <defaults>
</compile_context>

<pallas_src>
import functools
import math

import jax
import jax.numpy as jnp
from jax.experimental import pallas as pl
from jax.experimental.pallas import tpu as pltpu

_NT = (((1,), (1,)), ((), ()))  # contract last dims of both operands: a @ b.T


def _round_up(x, m):
    return (x + m - 1) // m * m


def _v_critic_kernel(x_ref, w_ref, b_ref, out_ref, *, in_dim, compute_dtype):
    """One batch tile: x (TB, in_dim) f32 -> V row (1, TB) f32."""
    num_layers, _, dmax = w_ref.shape
    h = x_ref[...]                                  # (TB, in_dim) f32
    width = in_dim                                  # true input width of layer l

    # Hidden layers: y = h @ W.T + b, then ReLU.  Padded weight rows / bias
    # lanes are zero, so padded feature columns of h stay exactly zero.
    for l in range(num_layers - 1):
        wl = w_ref[l, :, 0:width]                   # (Dmax, width)
        acc = jax.lax.dot_general(
            h.astype(compute_dtype), wl.astype(compute_dtype),
            dimension_numbers=_NT, preferred_element_type=jnp.float32)
        h = jnp.maximum(acc + b_ref[l], 0.0)        # (TB, Dmax) f32 elementwise
        width = dmax

    # Output head (Identity activation), computed transposed so the store is
    # lane-dense.  Only an 8-sublane slice of the last weight is fed to the
    # MXU (row 0 is the real output neuron, rows 1..7 are zero padding) rather
    # than all Dmax rows, cutting result pops / vreg pressure by Dmax/8.
    w_last = w_ref[num_layers - 1, 0:8, 0:width]    # (8, width)
    vt = jax.lax.dot_general(
        w_last.astype(compute_dtype), h.astype(compute_dtype),
        dimension_numbers=_NT, preferred_element_type=jnp.float32)  # (8, TB)
    v_row = vt[0:1, :] + b_ref[num_layers - 1][:, 0:1]              # (1, TB)
    out_ref[...] = v_row.astype(out_ref.dtype)


def v_critic_forward(state, params, *, block_batch=2048,
                     compute_dtype=jnp.float32):
    """state: (B, state_dim) -> (B, 1) f32.

    On v6e/v7x pair params built with weight_dtype=jnp.bfloat16 with
    compute_dtype=jnp.bfloat16 (accumulation stays f32 either way).  On v5e
    keep both float32 (no bf16 VALU; the kernel is DMA/overhead bound anyway).
    """
    w, b = params["w"], params["b"]
    num_layers, _, dmax = w.shape
    B, in_dim = state.shape
    assert block_batch % 128 == 0, "block_batch must be a multiple of 128"

    # Batch tile: as large as block_batch allows (per-grid-step overhead and
    # state DMA dominate, so bigger tiles are better), always a multiple of
    # 128 lanes for an unmasked lane-dense output store, and split into >= 2
    # grid steps when possible so both v7x TensorCores get work.
    tb = min(block_batch, _round_up(B, 128))
    if B > 128 and pl.cdiv(B, tb) < 2:
        tb = _round_up(pl.cdiv(B, 2), 128)

    xp = state.astype(jnp.float32)
    if tb > B:
        # Tiny-batch case only (pads at most 127 rows); larger batches rely on
        # Pallas ragged edge-block handling for the final tile, so there is no
        # wrapper-side HBM copy of the state.
        xp = jnp.pad(xp, ((0, tb - B), (0, 0)))
    rows = xp.shape[0]
    grid = (pl.cdiv(rows, tb),)
    out_w = grid[0] * tb

    sizes = params.get("layer_sizes")
    if sizes is not None:
        per_row_flops = 2 * sum(sizes[l] * sizes[l + 1] for l in range(num_layers))
    else:
        per_row_flops = 2 * num_layers * dmax * dmax
    flops = per_row_flops * rows
    bytes_accessed = (xp.size * 4 + w.size * w.dtype.itemsize
                      + b.size * b.dtype.itemsize + out_w * 4)

    # Scoped-VMEM budget from actual buffers (2x state tile, resident packed
    # weights/biases, h/acc intermediates, 2x output row) with 2x headroom,
    # capped below v7x's 64 MiB physical VMEM.
    vmem_needed = (2 * tb * in_dim * 4
                   + w.size * w.dtype.itemsize + b.size * b.dtype.itemsize
                   + 3 * tb * dmax * 4
                   + 2 * tb * 4)
    vmem_limit = int(min(60 * 2**20, max(16 * 2**20, 2 * vmem_needed)))

    kernel = functools.partial(_v_critic_kernel, in_dim=in_dim,
                               compute_dtype=compute_dtype)
    out = pl.pallas_call(
        kernel,
        out_shape=jax.ShapeDtypeStruct((1, out_w), jnp.float32),
        grid=grid,
        in_specs=[
            # pipelined (double-buffered) batch tile of the state; the ragged
            # final block is handled by Pallas -- junk rows only ever reach
            # output lanes >= B, which are sliced off below
            pl.BlockSpec((tb, in_dim), lambda i: (i, 0)),
            # packed weights / biases: constant index_map -> VMEM-resident
            # across all grid steps (no re-DMA)
            pl.BlockSpec((num_layers, dmax, dmax), lambda i: (0, 0, 0)),
            pl.BlockSpec((num_layers, 1, dmax), lambda i: (0, 0, 0)),
        ],
        # lane-dense output row: grid step i writes lanes [i*tb, (i+1)*tb)
        out_specs=pl.BlockSpec((1, tb), lambda i: (0, i)),
        compiler_params=pltpu.CompilerParams(
            dimension_semantics=("parallel",),
            vmem_limit_bytes=vmem_limit),
        cost_estimate=pl.CostEstimate(flops=flops, transcendentals=0,
                                      bytes_accessed=bytes_accessed),
    )(xp, w, b)
    return out[0, :B].reshape(B, 1)


def init_params(key, state_dim, hid_shape, hid_layers,
                weight_dtype=jnp.float32):
    """Packed parameters for V_Critic.

    layers = [state_dim] + hid_shape * hid_layers + [1]
    Weights keep PyTorch's (out_features, in_features) layout, zero-padded into
    one (L, Dmax, Dmax) stack (Dmax only 8-aligned -- no 128-lane feature pad);
    biases are packed into (L, 1, Dmax) and always stored f32.
    Use weight_dtype=jnp.bfloat16 on v6e/v7x to halve weight DMA.
    """
    layer_sizes = [state_dim] + list(hid_shape) * hid_layers + [1]
    num_layers = len(layer_sizes) - 1
    dmax = _round_up(max(layer_sizes), 8)

    w = jnp.zeros((num_layers, dmax, dmax), weight_dtype)
    b = jnp.zeros((num_layers, 1, dmax), jnp.float32)
    for l in range(num_layers):
        fan_in, fan_out = layer_sizes[l], layer_sizes[l + 1]
        key, kw, kb = jax.random.split(key, 3)
        bound = 1.0 / math.sqrt(fan_in)      # PyTorch nn.Linear default init
        wl = jax.random.uniform(kw, (fan_out, fan_in), jnp.float32, -bound, bound)
        bl = jax.random.uniform(kb, (fan_out,), jnp.float32, -bound, bound)
        w = w.at[l, :fan_out, :fan_in].set(wl.astype(weight_dtype))
        b = b.at[l, 0, :fan_out].set(bl)
    return {"w": w, "b": b, "layer_sizes": tuple(layer_sizes)}


def reference_forward(state, params):
    """Pure-JAX reference matching the PyTorch module."""
    sizes = params["layer_sizes"]
    w, b = params["w"], params["b"]
    num_layers = w.shape[0]
    h = state.astype(jnp.float32)
    for l in range(num_layers):
        wl = w[l, :sizes[l + 1], :sizes[l]].astype(jnp.float32)   # (out, in)
        bl = b[l, 0, :sizes[l + 1]]
        h = jnp.dot(h, wl.T, precision=jax.lax.Precision.HIGHEST) + bl
        if l < num_layers - 1:
            h = jnp.maximum(h, 0.0)
    return h


if __name__ == "__main__":
    key = jax.random.PRNGKey(0)

    # Shapes consistent with the module: state_dim=32, hid_shape=[32],
    # hid_layers=2  =>  layers = [32, 32, 32, 1]
    state_dim = 32
    hid_shape = [32]
    hid_layers = 2

    k_params, k_state, k_small = jax.random.split(key, 3)
    params = init_params(k_params, state_dim, hid_shape, hid_layers)

    # Ragged batch (not a multiple of 128): exercises the no-pad, two-tile,
    # ragged-final-block path (grid=2, one tile per v7x TensorCore).
    batch = 200
    state = jax.random.normal(k_state, (batch, state_dim), jnp.float32)
    out = jax.block_until_ready(v_critic_forward(state, params))
    ref = reference_forward(state, params)
    assert out.shape == (batch, 1)
    assert jnp.allclose(out, ref, atol=1e-4, rtol=1e-4), \
        float(jnp.max(jnp.abs(out - ref)))

    # Tiny batch: exercises the single 128-lane tile (lane-dense output) path.
    small_batch = 40
    state_s = jax.random.normal(k_small, (small_batch, state_dim), jnp.float32)
    out_s = jax.block_until_ready(v_critic_forward(state_s, params))
    ref_s = reference_forward(state_s, params)
    assert out_s.shape == (small_batch, 1)
    assert jnp.allclose(out_s, ref_s, atol=1e-4, rtol=1e-4), \
        float(jnp.max(jnp.abs(out_s - ref_s)))

    print("KERNEL_OK")
</pallas_src>

<mosaic_0001>
module attributes {stable_mosaic.version = 11 : i64} {
  func.func @_v_critic_kernel(%arg0: i32, %arg1: memref<128x32xf32, #tpu.memory_space<vmem>>, %arg2: memref<3x32x32xf32, #tpu.memory_space<vmem>>, %arg3: memref<3x1x32xf32, #tpu.memory_space<vmem>>, %arg4: memref<1x128xf32, #tpu.memory_space<vmem>>) attributes {dimension_semantics = [#tpu.dimension_semantics<parallel>], iteration_bounds = array<i64: 2>, scalar_prefetch = 0 : i64, scratch_operands = 0 : i64, tpu.core_type = #tpu.core_type<tc>, window_params = [{transform_indices = @transform_0, window_bounds = array<i64: 128, 32>}, {pipeline_mode = #tpu.pipeline_mode<synchronous>, transform_indices = @transform_1, window_bounds = array<i64: 3, 32, 32>}, {pipeline_mode = #tpu.pipeline_mode<synchronous>, transform_indices = @transform_2, window_bounds = array<i64: 3, 1, 32>}, {transform_indices = @transform_3, window_bounds = array<i64: 1, 128>}]} {
    %c0 = arith.constant 0 : index
    %c0_0 = arith.constant 0 : index
    %0 = vector.load %arg1[%c0, %c0_0] : memref<128x32xf32, #tpu.memory_space<vmem>>, vector<128x32xf32>
    %c0_1 = arith.constant 0 : index
    %c0_2 = arith.constant 0 : index
    %c0_3 = arith.constant 0 : index
    %1 = vector.load %arg2[%c0_1, %c0_2, %c0_3] : memref<3x32x32xf32, #tpu.memory_space<vmem>>, vector<1x32x32xf32>
    %2 = vector.shape_cast %1 : vector<1x32x32xf32> to vector<32x32xf32>
    %cst = arith.constant dense<0.000000e+00> : vector<128x32xf32>
    %3 = tpu.matmul %0, %2, %cst {dimension_numbers = #tpu.dot_dimension_numbers<[1], [1], [0], [0], [0, 0, 1, 0], [], []>} : vector<128x32xf32>, vector<32x32xf32>, vector<128x32xf32> -> vector<128x32xf32>
    %c0_4 = arith.constant 0 : index
    %c0_5 = arith.constant 0 : index
    %c0_6 = arith.constant 0 : index
    %4 = vector.load %arg3[%c0_4, %c0_5, %c0_6] : memref<3x1x32xf32, #tpu.memory_space<vmem>>, vector<1x1x32xf32>
    %5 = vector.shape_cast %4 : vector<1x1x32xf32> to vector<1x32xf32>
    %6 = vector.broadcast %5 : vector<1x32xf32> to vector<128x32xf32>
    %7 = arith.addf %3, %6 : vector<128x32xf32>
    %cst_7 = arith.constant 0.000000e+00 : f32
    %8 = vector.broadcast %cst_7 : f32 to vector<128x32xf32>
    %9 = arith.maximumf %7, %8 : vector<128x32xf32>
    %c1 = arith.constant 1 : index
    %c0_8 = arith.constant 0 : index
    %c0_9 = arith.constant 0 : index
    %10 = vector.load %arg2[%c1, %c0_8, %c0_9] : memref<3x32x32xf32, #tpu.memory_space<vmem>>, vector<1x32x32xf32>
    %11 = vector.shape_cast %10 : vector<1x32x32xf32> to vector<32x32xf32>
    %cst_10 = arith.constant dense<0.000000e+00> : vector<128x32xf32>
    %12 = tpu.matmul %9, %11, %cst_10 {dimension_numbers = #tpu.dot_dimension_numbers<[1], [1], [0], [0], [0, 0, 1, 0], [], []>} : vector<128x32xf32>, vector<32x32xf32>, vector<128x32xf32> -> vector<128x32xf32>
    %c1_11 = arith.constant 1 : index
    %c0_12 = arith.constant 0 : index
    %c0_13 = arith.constant 0 : index
    %13 = vector.load %arg3[%c1_11, %c0_12, %c0_13] : memref<3x1x32xf32, #tpu.memory_space<vmem>>, vector<1x1x32xf32>
    %14 = vector.shape_cast %13 : vector<1x1x32xf32> to vector<1x32xf32>
    %15 = vector.broadcast %14 : vector<1x32xf32> to vector<128x32xf32>
    %16 = arith.addf %12, %15 : vector<128x32xf32>
    %cst_14 = arith.constant 0.000000e+00 : f32
    %17 = vector.broadcast %cst_14 : f32 to vector<128x32xf32>
    %18 = arith.maximumf %16, %17 : vector<128x32xf32>
    %c2 = arith.constant 2 : index
    %c0_15 = arith.constant 0 : index
    %c0_16 = arith.constant 0 : index
    %19 = vector.load %arg2[%c2, %c0_15, %c0_16] : memref<3x32x32xf32, #tpu.memory_space<vmem>>, vector<1x8x32xf32>
    %20 = vector.shape_cast %19 : vector<1x8x32xf32> to vector<8x32xf32>
    %cst_17 = arith.constant dense<0.000000e+00> : vector<8x128xf32>
    %21 = tpu.matmul %20, %18, %cst_17 {dimension_numbers = #tpu.dot_dimension_numbers<[1], [1], [0], [0], [0, 0, 1, 0], [], []>} : vector<8x32xf32>, vector<128x32xf32>, vector<8x128xf32> -> vector<8x128xf32>
    %22 = vector.extract_strided_slice %21 {offsets = [0, 0], sizes = [1, 128], strides = [1, 1]} : vector<8x128xf32> to vector<1x128xf32>
    %c2_18 = arith.constant 2 : index
    %c0_19 = arith.constant 0 : index
    %c0_20 = arith.constant 0 : index
    %23 = vector.load %arg3[%c2_18, %c0_19, %c0_20] : memref<3x1x32xf32, #tpu.memory_space<vmem>>, vector<1x1x32xf32>
    %24 = vector.shape_cast %23 : vector<1x1x32xf32> to vector<1x32xf32>
    %25 = vector.extract_strided_slice %24 {offsets = [0, 0], sizes = [1, 1], strides = [1, 1]} : vector<1x32xf32> to vector<1x1xf32>
    %26 = vector.broadcast %25 : vector<1x1xf32> to vector<1x128xf32>
    %27 = arith.addf %22, %26 : vector<1x128xf32>
    %c0_21 = arith.constant 0 : index
    %c0_22 = arith.constant 0 : index
    %28 = vector.load %arg4[%c0_21, %c0_22] : memref<1x128xf32, #tpu.memory_space<vmem>>, vector<1x128xf32>
    tpu.vector_store %arg4[%c0_21, %c0_22], %27 {strides = array<i32>} : memref<1x128xf32, #tpu.memory_space<vmem>>, vector<1x128xf32>,
    return
  }
  func.func @transform_0(%arg0: i32) -> (i32, i32) {
    %c0_i32 = arith.constant 0 : i32
    %c0_i32_0 = arith.constant 0 : i32
    return %arg0, %c0_i32 : i32, i32
  }
  func.func @transform_1(%arg0: i32) -> (i32, i32, i32) {
    %c0_i32 = arith.constant 0 : i32
    %c0_i32_0 = arith.constant 0 : i32
    %c0_i32_1 = arith.constant 0 : i32
    %c0_i32_2 = arith.constant 0 : i32
    return %c0_i32, %c0_i32_0, %c0_i32_1 : i32, i32, i32
  }
  func.func @transform_2(%arg0: i32) -> (i32, i32, i32) {
    %c0_i32 = arith.constant 0 : i32
    %c0_i32_0 = arith.constant 0 : i32
    %c0_i32_1 = arith.constant 0 : i32
    %c0_i32_2 = arith.constant 0 : i32
    return %c0_i32, %c0_i32_0, %c0_i32_1 : i32, i32, i32
  }
  func.func @transform_3(%arg0: i32) -> (i32, i32) {
    %c0_i32 = arith.constant 0 : i32
    %c0_i32_0 = arith.constant 0 : i32
    return %c0_i32, %arg0 : i32, i32
  }
}

</mosaic_0001>

<bundles_post_ra>
// kernel: tpu_custom_call.1
= control target key start
LH: loop header
LB: loop body
LE: loop exit
PB: predicated region body
PF: predicated region fallthrough
CT: control target
= control target key end

     0   :  { %8 = vsyncpa [#allocation3], 0  ;;  %s1474_s0 = inlined_call_operand.vmem [shape: f32[200,32], index: 0, kind: input, shape index: {}]   ;;  %s1475_s1 = inlined_call_operand.vmem [shape: f32[3,32,32], index: 1, kind: input, shape index: {}]   ;;  %s1476_s2 = inlined_call_operand.vmem [shape: f32[3,1,32], index: 2, kind: input, shape index: {}]   ;;  %s1477_s3 = inlined_call_operand.hbm [shape: f32[1,256], index: 3, kind: output, shape index: {}]  }
   0x1   :  { %10 = vsyncpa [#allocation3 + $0x1], 0  ;;  %s1237_s12 = smov 0   ;;  %s1239_s13 = smov 0  }
   0x2   :  { %s1241_s14 = smov 0   ;;  %s1243_s15 = smov 0  }
   0x3 LB: > { %s876_s16 = sadd.s32 4294967295, %s1211_s15   ;;  %s877_s17 = sadd.s32 4294967294, %s1211_s15   ;;  %s1211_s15 = sphi %s1243_s15, %s1483_s15   ;;  %s1207_s14 = sphi %s1241_s14, %s1482_s14   ;;  %s1203_s13 = sphi %s1239_s13, %s1481_s13   ;;  %s1199_s12 = sphi %s1237_s12, %s1480_s12  }
   0x4   : > { %s1260_s18 = sadd.s32 1, %s1211_s15   ;;  %s91_s19 = sadd.s32 1, %s1207_s14 }
   0x5   : > { %s88_s20 = ssub.s32 %s1211_s15, %s1260_s18  ;;  %p101_p0 = scmp.ne.s32.totalorder %s1207_s14, %s1203_s13 }
   0x6   : > { %p89_p1 = scmp.eq.s32.totalorder %s88_s20, 0  ;;  %p102_p2 = scmp.eq.s32.totalorder %s876_s16, 1 }
   0x7   : > { %p107_p3 = scmp.ne.s32.totalorder %s1203_s13, %s1199_s12  ;;  %p108_p4 = scmp.eq.s32.totalorder %s877_s17, 1 }
   0x8   : > { %s1270_s21 = scalar_select %p89_p1, %s1207_s14, %s91_s19  }
   0x9   : > { %p1272_p5 = por %p102_p2, %p101_p0  ;;  %p1276_p6 = por %p108_p4, %p107_p3 }
   0xa   : > { %p880_p7 = scmp.ge.s32.totalorder %s1211_s15, 1  ;;  %p149_p8 = scmp.lt.s32.totalorder %s1211_s15, 3 }
   0xc   : > { %p150_p9 = pnand %p880_p7, %p149_p8 }
   0xd   : > { %s1288_s28 = sshll.u32 (!%p150_p9), %s876_s16, 4  ;;  %s174_s9 = sand.u32 (!%p150_p9), 1, %s1203_s13  }
   0xe   : > { %153 = sbr.rel (%p150_p9) target bundleno = 732 (0x2dc), region = 32  ;;  %p181_p10 = scmp.lt.s32.totalorder (!%p150_p9), %s1288_s28, 24 }
   0xf   : > { %s175_s10 = scalar_lea.vmem (!%p150_p9), [#allocation2], %s174_s9  ;;  %s1439_s19 = scalar_lea.hbm (!%p150_p9), %s1477_s3, %s1288_s28 }
  0x10   : > { %s822_s11 = sshll.u32 (!%p150_p9), %s175_s10, 4  ;;  %s810_s20 = scalar_lea.sflag (!%p150_p9), [#allocation3], %s174_s9  ;;  %s823_s11 = int_to_ptr.vmem [resolvable:$true] %s822_s11 }
  0x11   : > { %s1151_s24 = scalar_lea.vmem (!%p150_p9), %s823_s11, 16  ;;  %s1216_s25 = smov (!%p150_p9), [#allocation2]  }
  0x12   : > { %p1152_p11 = scmp.ne.s32.totalorder (!%p150_p9), %s823_s11, %s1151_s24  ;;  %s1155_s26 = sshll.u32 (!%p150_p9), %s1216_s25, 4  ;;  %s1156_s26 = int_to_ptr.vmem [resolvable:$false] %s1155_s26 }
  0x13   : > { %v209_v0 = vld [vmem:[%s1475_s1 + $0x18] sm:$0xff]  ;;  %vm217_vm0 = vcmask 261120   ;;  %v208_v1 = vld [vmem:[%s1475_s1 + $0x10] sm:$0xff]  ;;  %s182_s29 = scalar_select %p181_p10, %s1288_s28, 24  ;;  %v207_v2 = vld [vmem:[%s1475_s1 + $0x8] sm:$0xff]  ;;  %vm1214_vm1 = vmmov 0  }
  0x14   : > { %1009 = vmatprep.subr.msk.mxu1 %vm217_vm0, %v209_v0  ;;  %v206_v4 = vld [vmem:[%s1475_s1] sm:$0xff]  ;;  %v907_v5 = vld [vmem:[%s1475_s1 + $0x38] sm:$0xff]  ;;  %v906_v8 = vld [vmem:[%s1475_s1 + $0x30] sm:$0xff]  ;;  %p1153_p12 = pnand %p1152_p11, %p1272_p5  ;;  %s1157_s27 = scalar_lea.vmem %s1156_s26, 32 }
  0x15   : > { %1010 = vmatpush3.xpose.msk.msra.mxu1 %vm217_vm0, %v209_v0  ;;  %s882_s5 = sshll.u32 %s182_s29, 3  ;;  %v905_v11 = vld [vmem:[%s1475_s1 + $0x28] sm:$0xff]  ;;  %v904_v14 = vld [vmem:[%s1475_s1 + $0x20] sm:$0xff]  ;;  %p1158_p0 = scmp.lt.s32.totalorder %s823_s11, %s1156_s26 }
  0x16   : > { %1011 = vmatprep.subr.msk.mxu1 %vm217_vm0, %v208_v1  ;;  %s1302_s8 = scalar_lea.vmem %s1474_s0, %s882_s5  ;;  %v883_v24 = vld [vmem:[%s1476_s2] ss:$0 sm:$0xff]  ;;  %p1154_p13 = pneg %p1153_p12 }
  0x17   : > { %v190_v3 = vld [vmem:[%s1302_s8] sm:$0xff]  ;;  %v191_v6 = vld [vmem:[%s1302_s8 + $0x8] sm:$0xff]  ;;  %v192_v7 = vld [vmem:[%s1302_s8 + $0x10] sm:$0xff]  ;;  %p1159_p1 = scmp.lt.s32.totalorder %s1157_s27, %s1151_s24 }
  0x18   : > { %1017 = vmatprep.mubr.msk.f32.mxu1 %vm217_vm0, %v190_v3  ;;  %v193_v9 = vld [vmem:[%s1302_s8 + $0x18] sm:$0xff]  ;;  %v194_v10 = vld [vmem:[%s1302_s8 + $0x20] sm:$0xff]  ;;  %v195_v12 = vld [vmem:[%s1302_s8 + $0x28] sm:$0xff] }
  0x19   : > { %1012 = vmatpush3.xpose.msk.msra.mxu1 %vm217_vm0, %v208_v1  ;;  %v196_v13 = vld [vmem:[%s1302_s8 + $0x30] sm:$0xff]  ;;  %v197_v15 = vld [vmem:[%s1302_s8 + $0x38] sm:$0xff]  ;;  %v198_v16 = vld [vmem:[%s1302_s8 + $0x40] sm:$0xff]  ;;  %p1160_p2 = por %p1159_p1, %p1158_p0 }
  0x1a   : > { %1013 = vmatprep.subr.msk.mxu1 %vm217_vm0, %v207_v2  ;;  %v199_v17 = vld [vmem:[%s1302_s8 + $0x48] sm:$0xff]  ;;  %v200_v18 = vld [vmem:[%s1302_s8 + $0x50] sm:$0xff]  ;;  %v201_v19 = vld [vmem:[%s1302_s8 + $0x58] sm:$0xff] }
  0x1b   : > { %v202_v20 = vld [vmem:[%s1302_s8 + $0x60] sm:$0xff]  ;;  %v203_v21 = vld [vmem:[%s1302_s8 + $0x68] sm:$0xff]  ;;  %v204_v22 = vld [vmem:[%s1302_s8 + $0x70] sm:$0xff]  ;;  %p1161_p3 = pnand %p1160_p2, %p1154_p13 }
  0x1c   : > { %v205_v23 = vld [vmem:[%s1302_s8 + $0x78] sm:$0xff] }
  0x1d   : > { %1014 = vmatpush3.xpose.msk.msra.mxu1 %vm217_vm0, %v207_v2 }
  0x1e   : > { %1015 = vmatprep.subr.msk.mxu1 %vm217_vm0, %v206_v4 }
  0x21   : > { %1016 = vmatpush3.xpose.msk.msra.mxu1 %vm217_vm0, %v206_v4 }
  0x22   : > { %1041 = vmatprep.subr.msk.mxu1 %vm217_vm0, %v907_v5 }
  0x24   : > { %1018 = vmatmul.mubr.msk.f32.vlgmr.msra.gmra.mxu1 %vm217_vm0, %v191_v6 }
  0x25   : > { %1020 = vmatprep.mubr.msk.f32.mxu1 %vm217_vm0, %v192_v7  ;;  %1042 = vmatpush3.xpose.msk.msra.mxu1 %vm217_vm0, %v907_v5 }
  0x26   : > { %1043 = vmatprep.subr.msk.mxu1 %vm217_vm0, %v906_v8 }
  0x28   : > { %1021 = vmatmul.mubr.msk.f32.gmra.mxu1 %vm217_vm0, %v193_v9  ;;  %v1213_v9 = vmov 0.0  }
  0x29   : > { %1023 = vmatprep.mubr.msk.f32.mxu1 %vm217_vm0, %v194_v10  ;;  %1044 = vmatpush3.xpose.msk.msra.mxu1 %vm217_vm0, %v906_v8  ;;  %v948_v10 = vld [vmem:[%s1476_s2 + $0x2] sm:$0x1] }
  0x2a   : > { %1045 = vmatprep.subr.msk.mxu1 %vm217_vm0, %v905_v11  ;;  %1073 = vmatprep.subr.mxu0 %v1213_v9 }
  0x2b   : > { %1105 = vmatprep.mubr.msk.f32.mxu0 %vm1214_vm1, %v1213_v9 }
  0x2c   : > { %1024 = vmatmul.mubr.msk.f32.gmra.mxu1 %vm217_vm0, %v195_v12 }
  0x2d   : > { %1026 = vmatprep.mubr.msk.f32.mxu1 %vm217_vm0, %v196_v13  ;;  %1046 = vmatpush3.xpose.msk.msra.mxu1 %vm217_vm0, %v905_v11  ;;  %v1215_v11 = vmov 0  }
  0x2e   : > { %1047 = vmatprep.subr.msk.mxu1 %vm217_vm0, %v904_v14  ;;  %1150 = vset.pattern.permute.xlu0 %v1215_v11 }
  0x2f   : > { %800 = vperm.xlu0 %1150, %v948_v10  }
  0x30   : > { %1027 = vmatmul.mubr.msk.f32.gmra.mxu1 %vm217_vm0, %v197_v15 }
  0x31   : > { %1029 = vmatprep.mubr.msk.f32.mxu1 %vm217_vm0, %v198_v16  ;;  %1048 = vmatpush3.xpose.msk.msra.mxu1 %vm217_vm0, %v904_v14 }
  0x34   : > { %1030 = vmatmul.mubr.msk.f32.gmra.mxu1 %vm217_vm0, %v199_v17 }
  0x35   : > { %1032 = vmatprep.mubr.msk.f32.mxu1 %vm217_vm0, %v200_v18 }
  0x38   : > { %1033 = vmatmul.mubr.msk.f32.gmra.mxu1 %vm217_vm0, %v201_v19 }
  0x39   : > { %1035 = vmatprep.mubr.msk.f32.mxu1 %vm217_vm0, %v202_v20 }
  0x3c   : > { %1036 = vmatmul.mubr.msk.f32.gmra.mxu1 %vm217_vm0, %v203_v21 }
  0x3d   : > { %1038 = vmatprep.mubr.msk.f32.mxu1 %vm217_vm0, %v204_v22 }
  0x40   : > { %1039 = vmatmul.mubr.msk.f32.gmra.mxu1 %vm217_vm0, %v205_v23 }
  0xe4   : > { %v1019_v25 = vpop.f32.mrf.mxu1 }
  0xe5   : > { %v350_v26 = vadd.f32 %v1019_v25, %v883_v24 }
  0xe6   : > { %v344_v27 = vpop.f32.mrf.mxu1 }
  0xe7   : > { %v345_v28 = vadd.f32 %v883_v24, %v344_v27  ;;  %v424_v31 = vmax.f32 %v350_v26, 0.0  ;;  %v909_v26 = vld [vmem:[%s1476_s2 + $0x1] ss:$0 sm:$0xff] }
  0xe8   : > { %v1022_v29 = vpop.f32.mrf.mxu1 }
  0xe9   : > { %v423_v30 = vmax.f32 %v345_v28, 0.0  ;;  %v360_v32 = vadd.f32 %v1022_v29, %v883_v24 }
  0xea   : > { %v354_v33 = vpop.f32.mrf.mxu1 }
  0xeb   : > { %v355_v34 = vadd.f32 %v883_v24, %v354_v33  ;;  %1049 = vmatprep.mubr.msk.f32.mxu1 %vm217_vm0, %v423_v30  ;;  %v426_v37 = vmax.f32 %v360_v32, 0.0 }
  0xec   : > { %v1025_v35 = vpop.f32.mrf.mxu1  ;;  %1050 = vmatmul.mubr.msk.f32.vlgmr.msra.gmra.mxu1 %vm217_vm0, %v424_v31 }
  0xed   : > { %v425_v36 = vmax.f32 %v355_v34, 0.0  ;;  %v370_v38 = vadd.f32 %v1025_v35, %v883_v24 }
  0xee   : > { %v364_v39 = vpop.f32.mrf.mxu1 }
  0xef   : > { %v365_v40 = vadd.f32 %v883_v24, %v364_v39  ;;  %1052 = vmatprep.mubr.msk.f32.mxu1 %vm217_vm0, %v425_v36  ;;  %v428_v43 = vmax.f32 %v370_v38, 0.0 }
  0xf0   : > { %v1028_v41 = vpop.f32.mrf.mxu1  ;;  %1053 = vmatmul.mubr.msk.f32.gmra.mxu1 %vm217_vm0, %v426_v37 }
  0xf1   : > { %v427_v42 = vmax.f32 %v365_v40, 0.0  ;;  %v380_v44 = vadd.f32 %v1028_v41, %v883_v24 }
  0xf2   : > { %v374_v45 = vpop.f32.mrf.mxu1 }
  0xf3   : > { %v375_v46 = vadd.f32 %v883_v24, %v374_v45  ;;  %1055 = vmatprep.mubr.msk.f32.mxu1 %vm217_vm0, %v427_v42  ;;  %v430_v49 = vmax.f32 %v380_v44, 0.0 }
  0xf4   : > { %v1031_v47 = vpop.f32.mrf.mxu1  ;;  %1056 = vmatmul.mubr.msk.f32.gmra.mxu1 %vm217_vm0, %v428_v43 }
  0xf5   : > { %v429_v48 = vmax.f32 %v375_v46, 0.0  ;;  %v390_v50 = vadd.f32 %v1031_v47, %v883_v24 }
  0xf6   : > { %v384_v51 = vpop.f32.mrf.mxu1 }
  0xf7   : > { %v385_v52 = vadd.f32 %v883_v24, %v384_v51  ;;  %1058 = vmatprep.mubr.msk.f32.mxu1 %vm217_vm0, %v429_v48  ;;  %v432_v55 = vmax.f32 %v390_v50, 0.0 }
  0xf8   : > { %v1034_v53 = vpop.f32.mrf.mxu1  ;;  %1059 = vmatmul.mubr.msk.f32.gmra.mxu1 %vm217_vm0, %v430_v49 }
  0xf9   : > { %v431_v54 = vmax.f32 %v385_v52, 0.0  ;;  %v400_v56 = vadd.f32 %v1034_v53, %v883_v24 }
  0xfa   : > { %v394_v57 = vpop.f32.mrf.mxu1 }
  0xfb   : > { %v395_v58 = vadd.f32 %v883_v24, %v394_v57  ;;  %1061 = vmatprep.mubr.msk.f32.mxu1 %vm217_vm0, %v431_v54  ;;  %v434_v61 = vmax.f32 %v400_v56, 0.0 }
  0xfc   : > { %v1037_v59 = vpop.f32.mrf.mxu1  ;;  %1062 = vmatmul.mubr.msk.f32.gmra.mxu1 %vm217_vm0, %v432_v55 }
  0xfd   : > { %v433_v60 = vmax.f32 %v395_v58, 0.0  ;;  %v410_v62 = vadd.f32 %v1037_v59, %v883_v24 }
  0xfe   : > { %v404_v63 = vpop.f32.mrf.mxu1 }
  0xff   : > { %v405_v0 = vadd.f32 %v883_v24, %v404_v63  ;;  %1064 = vmatprep.mubr.msk.f32.mxu1 %vm217_vm0, %v433_v60  ;;  %v436_v3 = vmax.f32 %v410_v62, 0.0  ;;  %v803_v62 = vlaneseq }
 0x100   : > { %v1040_v1 = vpop.f32.mrf.mxu1  ;;  %1065 = vmatmul.mubr.msk.f32.gmra.mxu1 %vm217_vm0, %v434_v61  ;;  %v930_v61 = vld [vmem:[%s1475_s1 + $0x40] sm:$0xff] }
 0x101   : > { %v435_v2 = vmax.f32 %v405_v0, 0.0  ;;  %v420_v4 = vadd.f32 %v1040_v1, %v883_v24  ;;  %v804_v63 = vshrl.u32 %v803_v62, 7  ;;  %v801_v1 = vpop.permute.xlu0 %800 }
 0x102   : > { %v414_v5 = vpop.f32.mrf.mxu1 }
 0x103   : > { %v415_v6 = vadd.f32 %v883_v24, %v414_v5  ;;  %1067 = vmatprep.mubr.msk.f32.mxu1 %vm217_vm0, %v435_v2  ;;  %v438_v8 = vmax.f32 %v420_v4, 0.0  ;;  %v805_v0 = vsub.s32 0, %v804_v63 }
 0x104   : > { %1068 = vmatmul.mubr.msk.f32.gmra.mxu1 %vm217_vm0, %v436_v3 }
 0x105   : > { %v437_v7 = vmax.f32 %v415_v6, 0.0  ;;  %v806_v2 = vrot.slane %v801_v1, %v805_v0 }
 0x107   : > { %1070 = vmatprep.mubr.msk.f32.mxu1 %vm217_vm0, %v437_v7 }
 0x108   : > { %1071 = vmatmul.mubr.msk.f32.gmra.mxu1 %vm217_vm0, %v438_v8 }
 0x1ac   : > { %v1387_v12 = vpop.f32.mrf.mxu1 }
 0x1ad   : > { %v584_v56 = vadd.f32 %v1387_v12, %v909_v26 }
 0x1ae   : > { %v1389_v13 = vpop.f32.mrf.mxu1 }
 0x1af   : > { %v658_v58 = vmax.f32 %v584_v56, 0.0  ;;  %v579_v59 = vadd.f32 %v909_v26, %v1389_v13 }
 0x1b0   : > { %v1054_v14 = vpop.f32.mrf.mxu1 }
 0x1b1   : > { %v594_v52 = vadd.f32 %v1054_v14, %v909_v26  ;;  %v657_v60 = vmax.f32 %v579_v59, 0.0 }
 0x1b2   : > { %v1391_v15 = vpop.f32.mrf.mxu1 }
 0x1b3   : > { %v660_v54 = vmax.f32 %v594_v52, 0.0  ;;  %v589_v55 = vadd.f32 %v909_v26, %v1391_v15 }
 0x1b4   : > { %v1057_v16 = vpop.f32.mrf.mxu1 }
 0x1b5   : > { %v604_v48 = vadd.f32 %v1057_v16, %v909_v26  ;;  %v659_v57 = vmax.f32 %v589_v55, 0.0 }
 0x1b6   : > { %v598_v17 = vpop.f32.mrf.mxu1 }
 0x1b7   : > { %v662_v50 = vmax.f32 %v604_v48, 0.0  ;;  %v599_v51 = vadd.f32 %v909_v26, %v598_v17 }
 0x1b8   : > { %v1060_v18 = vpop.f32.mrf.mxu1 }
 0x1b9   : > { %v614_v44 = vadd.f32 %v1060_v18, %v909_v26  ;;  %v661_v53 = vmax.f32 %v599_v51, 0.0 }
 0x1ba   : > { %v608_v19 = vpop.f32.mrf.mxu1 }
 0x1bb   : > { %v664_v46 = vmax.f32 %v614_v44, 0.0  ;;  %v609_v47 = vadd.f32 %v909_v26, %v608_v19 }
 0x1bc   : > { %v1063_v20 = vpop.f32.mrf.mxu1 }
 0x1bd   : > { %v624_v40 = vadd.f32 %v1063_v20, %v909_v26  ;;  %v663_v49 = vmax.f32 %v609_v47, 0.0 }
 0x1be   : > { %v618_v21 = vpop.f32.mrf.mxu1 }
 0x1bf   : > { %v666_v42 = vmax.f32 %v624_v40, 0.0  ;;  %v619_v43 = vadd.f32 %v909_v26, %v618_v21 }
 0x1c0   : > { %v1066_v22 = vpop.f32.mrf.mxu1 }
 0x1c1   : > { %v634_v36 = vadd.f32 %v1066_v22, %v909_v26  ;;  %v665_v45 = vmax.f32 %v619_v43, 0.0 }
 0x1c2   : > { %v628_v23 = vpop.f32.mrf.mxu1 }
 0x1c3   : > { %v668_v38 = vmax.f32 %v634_v36, 0.0  ;;  %v629_v39 = vadd.f32 %v909_v26, %v628_v23 }
 0x1c4   : > { %v1069_v24 = vpop.f32.mrf.mxu1 }
 0x1c5   : > { %v644_v32 = vadd.f32 %v1069_v24, %v909_v26  ;;  %v667_v41 = vmax.f32 %v629_v39, 0.0 }
 0x1c6   : > { %v638_v25 = vpop.f32.mrf.mxu1 }
 0x1c7   : > { %v670_v34 = vmax.f32 %v644_v32, 0.0  ;;  %v639_v35 = vadd.f32 %v909_v26, %v638_v25 }
 0x1c8   : > { %v1072_v27 = vpop.f32.mrf.mxu1 }
 0x1c9   : > { %v654_v28 = vadd.f32 %v1072_v27, %v909_v26  ;;  %v669_v37 = vmax.f32 %v639_v35, 0.0 }
 0x1ca   : > { %v648_v29 = vpop.f32.mrf.mxu1 }
 0x1cb   : > { %v672_v30 = vmax.f32 %v654_v28, 0.0  ;;  %v649_v31 = vadd.f32 %v909_v26, %v648_v29 }
 0x1cd   : > { %1074 = vmatpush3.xpose.msk.msra.mxu0 %vm217_vm0, %v672_v30  ;;  %v671_v33 = vmax.f32 %v649_v31, 0.0 }
 0x1ce   : > { %1075 = vmatprep.subr.mxu0 %v1213_v9 }
 0x1d1   : > { %1076 = vmatpush3.xpose.msk.msra.mxu0 %vm217_vm0, %v671_v33 }
 0x1d2   : > { %1077 = vmatprep.subr.mxu0 %v1213_v9 }
 0x1d5   : > { %1078 = vmatpush3.xpose.msk.msra.mxu0 %vm217_vm0, %v670_v34 }
 0x1d6   : > { %1079 = vmatprep.subr.mxu0 %v1213_v9 }
 0x1d9   : > { %1080 = vmatpush3.xpose.msk.msra.mxu0 %vm217_vm0, %v669_v37 }
 0x1da   : > { %1081 = vmatprep.subr.mxu0 %v1213_v9 }
 0x1dd   : > { %1082 = vmatpush3.xpose.msk.msra.mxu0 %vm217_vm0, %v668_v38 }
 0x1de   : > { %1083 = vmatprep.subr.mxu0 %v1213_v9 }
 0x1e1   : > { %1084 = vmatpush3.xpose.msk.msra.mxu0 %vm217_vm0, %v667_v41 }
 0x1e2   : > { %1085 = vmatprep.subr.mxu0 %v1213_v9 }
 0x1e5   : > { %1086 = vmatpush3.xpose.msk.msra.mxu0 %vm217_vm0, %v666_v42 }
 0x1e6   : > { %1087 = vmatprep.subr.mxu0 %v1213_v9 }
 0x1e9   : > { %1088 = vmatpush3.xpose.msk.msra.mxu0 %vm217_vm0, %v665_v45 }
 0x1ea   : > { %1089 = vmatprep.subr.mxu0 %v1213_v9 }
 0x1ed   : > { %1090 = vmatpush3.xpose.msk.msra.mxu0 %vm217_vm0, %v664_v46 }
 0x1ee   : > { %1091 = vmatprep.subr.mxu0 %v1213_v9 }
 0x1f1   : > { %1092 = vmatpush3.xpose.msk.msra.mxu0 %vm217_vm0, %v663_v49 }
 0x1f2   : > { %1093 = vmatprep.subr.mxu0 %v1213_v9 }
 0x1f5   : > { %1094 = vmatpush3.xpose.msk.msra.mxu0 %vm217_vm0, %v662_v50 }
 0x1f6   : > { %1095 = vmatprep.subr.mxu0 %v1213_v9 }
 0x1f9   : > { %1096 = vmatpush3.xpose.msk.msra.mxu0 %vm217_vm0, %v661_v53 }
 0x1fa   : > { %1097 = vmatprep.subr.mxu0 %v1213_v9 }
 0x1fd   : > { %1098 = vmatpush3.xpose.msk.msra.mxu0 %vm217_vm0, %v660_v54 }
 0x1fe   : > { %1099 = vmatprep.subr.mxu0 %v1213_v9 }
 0x201   : > { %1100 = vmatpush3.xpose.msk.msra.mxu0 %vm217_vm0, %v659_v57 }
 0x202   : > { %1101 = vmatprep.subr.mxu0 %v1213_v9 }
 0x205   : > { %1102 = vmatpush3.xpose.msk.msra.mxu0 %vm217_vm0, %v658_v58 }
 0x206   : > { %1103 = vmatprep.subr.mxu0 %v1213_v9 }
 0x209   : > { %1104 = vmatpush3.xpose.msk.msra.mxu0 %vm217_vm0, %v657_v60 }
 0x20c   : > { %1106 = vmatmul.mubr.msk.f32.vlgmr.msra.gmra.mxu0 %vm217_vm0, %v930_v61 }
 0x2cc   : > { %v792_v3 = vpop.f32.mrf.mxu0 }
 0x2cd   : > { %v807_v4 = vadd.f32 %v806_v2, %v792_v3 }
 0x2ce   : > { %v1107_v5 = vpop.f32.mrf.mxu0 }
 0x2cf   : > { %808 = vst [vmem:[%s175_s10] sm:$0x1] %v807_v4 }
 0x2d0   : > { %1164 = shalt.err (!%p1161_p3)
}
 0x2d1   : > { %s1165_s28 = scalar_lea.hbm %s1439_s19, 16  ;;  %s1169_s4 = scalar_lea.hbm %s1477_s3, 32 }
 0x2d2   : > { %p1166_p4 = scmp.ne.s32.totalorder %s1439_s19, %s1165_s28  ;;  %p1170_p9 = scmp.lt.s32.totalorder %s1439_s19, %s1477_s3 }
 0x2d3   : > { %p1171_p10 = scmp.lt.s32.totalorder %s1169_s4, %s1165_s28 }
 0x2d4   : > { %p1167_p7 = pnand %p1166_p4, %p1272_p5 }
 0x2d5   : > { %p1172_p11 = por %p1171_p10, %p1170_p9 }
 0x2d6   : > { %p1168_p8 = pneg %p1167_p7 }
 0x2d8   : > { %p1173_p12 = pnand %p1172_p11, %p1168_p8 }
 0x2da   : > { %1176 = shalt.err (!%p1173_p12)
}
 0x2db   : > { %1108 = dma.vmem_to_hbm [thread:$0]  (%p1272_p5), %s823_s11, 16, %s1439_s19, %s810_s20  }
 0x2dc PF: > { %p1114_p13 = scmp.ge.s32.totalorder %s1211_s15, 2  ;;  %s834_s7 = sand.u32 1, %s1199_s12  }
 0x2dd   : > { %s835_s8 = scalar_lea.sflag [#allocation3], %s834_s7 }
 0x2de   : > { %p1111_p0 = pnand %p1114_p13, %p1276_p6 }
 0x2e0   : > { %p1112_p1 = pneg %p1111_p0 }
 0x2e2   : > { %1194 = dma.done.wait (%p1112_p1), %s835_s8, 16  }
 0x2e3   : > { %1196 = vsyncadd (%p1112_p1), %s835_s8, 4294967280  ;;  %p13_p2 = scmp.ge.s32.totalorder %s1260_s18, 4   ;;  %s1480_s12 = smov %s1203_s13 }
 0x2e4   : > { %s1481_s13 = smov %s1207_s14  ;;  %s1482_s14 = smov %s1270_s21 }
 0x2e5   : > { %s1483_s15 = smov %s1260_s18  ;;  %15 = sbr.rel (!%p13_p2) target bundleno = 3 (0x3), region = 71 }
 0x2ea   :  { %839 = vsyncpa [#allocation3], 1 }
 0x2eb   :  { %841 = vsyncpa [#allocation3 + $0x1], 1 }

</bundles_post_ra>
